<compile_context>
chip_gen: v5e
topology: v5e:2x2
jax: 0.10.0
libtpu: 0.0.40
codegen_flags: <defaults>
</compile_context>

<pallas_src>
import jax
import jax.numpy as jnp
from jax.experimental import pallas as pl
from jax.experimental.pallas import tpu as pltpu


_TARGET_BLOCK_BYTES = 8 * 1024 * 1024   # ~8 MiB tiles amortize the ~0.35 us/step cost
_PALLAS_MIN_ELEMENTS = 1 << 18          # below ~256K elems, XLA's fused add is already at roofline
_LANE = 128
_SUBLANE_BY_ITEMSIZE = {8: 8, 4: 8, 2: 16, 1: 32}


def _round_up(v: int, m: int) -> int:
    return (v + m - 1) // m * m


def _cdiv(a: int, b: int) -> int:
    return (a + b - 1) // b


def _vmem_budget_bytes() -> int:
    """Per-TensorCore VMEM capacity; falls back to the v7x minimum (64 MiB)."""
    try:
        info = pltpu.get_tpu_info()
        cap = getattr(info, "vmem_capacity_bytes", None)
        if cap:
            return int(cap)
    except Exception:
        pass
    return 64 * 1024 * 1024


def _add_kernel(x_ref, o_ref):
    x = x_ref[...]
    o_ref[...] = x + x


def _pick_block_rows(rows: int, row_bytes: int, sub: int, target_bytes: int) -> int:
    """Sublane-aligned rows per block: ~target_bytes, but keep >=2 grid steps if possible."""
    target_rows = max(sub, (target_bytes // row_bytes) // sub * sub)
    two_step_rows = _round_up(_cdiv(rows, 2), sub)     # >=2 steps -> both v7x TCs get work
    block_rows = max(sub, min(target_rows, two_step_rows))
    return min(block_rows, _round_up(rows, sub))


def _add_pallas(x: jax.Array) -> jax.Array:
    """x + x via a gridded, lane-dense Pallas kernel."""
    orig_shape = x.shape
    n = x.size
    if n == 0:
        return x + x

    itemsize = jnp.dtype(x.dtype).itemsize
    sub = _SUBLANE_BY_ITEMSIZE.get(itemsize, 8)
    budget = _vmem_budget_bytes()
    target_bytes = min(_TARGET_BLOCK_BYTES, budget // 8)

    pad = 0
    if (
        x.ndim >= 2
        and x.shape[-1] % _LANE == 0
        and n // x.shape[-1] >= sub
        and x.shape[-1] * itemsize * sub <= target_bytes
    ):
        # Native layout: collapse leading dims (free, contiguous) and grid over rows.
        cols = x.shape[-1]
        rows = n // cols
        x2d = x.reshape(rows, cols)
    else:
        # Flat layout: widest lane count whose (cols * sublane) tile divides n exactly.
        flat = x.reshape(-1)
        cols = next((c for c in (1024, 512, 256, 128) if n % (c * sub) == 0), 0)
        if cols == 0:
            # TODO(synk): unaligned flat sizes still pay one pad + one slice HBM pass.
            cols = _LANE
            padded = _round_up(n, cols * sub)
            pad = padded - n
            flat = jnp.pad(flat, (0, pad))
        rows = flat.size // cols
        x2d = flat.reshape(rows, cols)

    block_rows = _pick_block_rows(rows, cols * itemsize, sub, target_bytes)
    block_bytes = block_rows * cols * itemsize
    # Double-buffered in + out, plus slack; floor at 32 MiB, never above physical VMEM.
    vmem_limit = int(min(budget, max(32 * 1024 * 1024, 4 * block_bytes + (4 << 20))))
    grid = (_cdiv(rows, block_rows),)

    out2d = pl.pallas_call(
        _add_kernel,
        out_shape=jax.ShapeDtypeStruct((rows, cols), x.dtype),
        grid=grid,
        in_specs=[pl.BlockSpec((block_rows, cols), lambda i: (i, 0))],
        out_specs=pl.BlockSpec((block_rows, cols), lambda i: (i, 0)),
        compiler_params=pltpu.CompilerParams(
            dimension_semantics=("parallel",),
            vmem_limit_bytes=vmem_limit,
        ),
    )(x2d)

    if pad:
        return out2d.reshape(-1)[:n].reshape(orig_shape)
    return out2d.reshape(orig_shape)


def add_module_forward(x: jax.Array, *, force_pallas: bool = False) -> jax.Array:
    """Pallas equivalent of AddModule.forward: returns x + x (same shape/dtype).

    Tiny inputs (like the module's 5-element example) route to a plain XLA add
    (kernel-launch + DMA setup would dominate); larger inputs, or
    force_pallas=True, take the tiled lane-dense Pallas path.
    """
    if not force_pallas and x.size < _PALLAS_MIN_ELEMENTS:
        return x + x
    return _add_pallas(x)


if __name__ == "__main__":
    key = jax.random.PRNGKey(0)

    # 1. The module's canonical example input: length-5 int32 vector (XLA path).
    x_ex = jax.random.randint(key, (5,), -10, 10, dtype=jnp.int32)
    out_ex = jax.block_until_ready(add_module_forward(x_ex))
    assert out_ex.shape == (5,) and out_ex.dtype == jnp.int32
    assert bool(jnp.all(out_ex == x_ex + x_ex))

    # 2. Same tiny input forced onto the Pallas kernel (flat / 128-lane branch).
    out_ex_k = jax.block_until_ready(add_module_forward(x_ex, force_pallas=True))
    assert out_ex_k.shape == (5,) and out_ex_k.dtype == jnp.int32
    assert bool(jnp.all(out_ex_k == x_ex + x_ex))

    # 3. Large 1-D int32: auto-dispatch -> flat branch, 1024 lanes, 2 grid steps, no pad.
    k1 = jax.random.fold_in(key, 1)
    x1 = jax.random.randint(k1, (5 * 65536,), -100, 100, dtype=jnp.int32)
    o1 = jax.block_until_ready(add_module_forward(x1))
    assert o1.shape == x1.shape and o1.dtype == x1.dtype
    assert bool(jnp.all(o1 == x1 + x1))

    # 4. 2-D int32 with 128-multiple last dim: auto-dispatch -> native-layout branch.
    k2 = jax.random.fold_in(key, 2)
    x2 = jax.random.randint(k2, (512, 640), -100, 100, dtype=jnp.int32)
    o2 = jax.block_until_ready(add_module_forward(x2))
    assert o2.shape == x2.shape and o2.dtype == x2.dtype
    assert bool(jnp.all(o2 == x2 + x2))

    # 5. bf16 through the forced Pallas path (exercises the 16-row sublane alignment).
    k3 = jax.random.fold_in(key, 3)
    x3 = jax.random.normal(k3, (272, 384), dtype=jnp.bfloat16)
    o3 = jax.block_until_ready(add_module_forward(x3, force_pallas=True))
    assert o3.shape == x3.shape and o3.dtype == x3.dtype
    assert bool(jnp.all(o3 == x3 + x3))

    print("KERNEL_OK")
</pallas_src>

<mosaic_0001>
module attributes {stable_mosaic.version = 11 : i64} {
  func.func @_add_kernel(%arg0: i32, %arg1: memref<8x128xi32, #tpu.memory_space<vmem>>, %arg2: memref<8x128xi32, #tpu.memory_space<vmem>>) attributes {dimension_semantics = [#tpu.dimension_semantics<parallel>], iteration_bounds = array<i64: 1>, scalar_prefetch = 0 : i64, scratch_operands = 0 : i64, tpu.core_type = #tpu.core_type<tc>, window_params = [{transform_indices = @transform_0, window_bounds = array<i64: 8, 128>}, {transform_indices = @transform_1, window_bounds = array<i64: 8, 128>}]} {
    %c0 = arith.constant 0 : index
    %c0_0 = arith.constant 0 : index
    %0 = vector.load %arg1[%c0, %c0_0] : memref<8x128xi32, #tpu.memory_space<vmem>>, vector<8x128xi32>
    %1 = arith.addi %0, %0 : vector<8x128xi32>
    %c0_1 = arith.constant 0 : index
    %c0_2 = arith.constant 0 : index
    %2 = vector.load %arg2[%c0_1, %c0_2] : memref<8x128xi32, #tpu.memory_space<vmem>>, vector<8x128xi32>
    tpu.vector_store %arg2[%c0_1, %c0_2], %1 {strides = array<i32>} : memref<8x128xi32, #tpu.memory_space<vmem>>, vector<8x128xi32>,
    return
  }
  func.func @transform_0(%arg0: i32) -> (i32, i32) {
    %c0_i32 = arith.constant 0 : i32
    %c0_i32_0 = arith.constant 0 : i32
    return %arg0, %c0_i32 : i32, i32
  }
  func.func @transform_1(%arg0: i32) -> (i32, i32) {
    %c0_i32 = arith.constant 0 : i32
    %c0_i32_0 = arith.constant 0 : i32
    return %arg0, %c0_i32 : i32, i32
  }
}

</mosaic_0001>

<bundles_post_ra>
// kernel: tpu_custom_call.1
= control target key start
LH: loop header
LB: loop body
LE: loop exit
PB: predicated region body
PF: predicated region fallthrough
CT: control target
= control target key end

     0   :  { %6 = vsyncpa [#allocation3], 0  ;;  %s115_s0 = inlined_call_operand.hbm [shape: s32[8,128], index: 0, kind: input, shape index: {}]   ;;  %s116_s1 = inlined_call_operand.hbm [shape: s32[8,128], index: 1, kind: output, shape index: {}]  }
   0x1   :  { %7 = vsyncpa [#allocation4], 0  ;;  %s13_s8 = sshll.u32 %s115_s0, 4  ;;  %s97_s9 = smov [#allocation2]   ;;  %s14_s8 = int_to_ptr.hbm [resolvable:$true] %s13_s8 }
   0x2   :  { %s15_s10 = sshll.u32 %s97_s9, 4  ;;  %s16_s10 = int_to_ptr.vmem [resolvable:$true] %s15_s10 }
   0x3   :  { %18 = dma.hbm_to_vmem [thread:$0]  %s14_s8, 128, %s16_s10, [#allocation3]  }
   0x4   :  { %93 = dma.done.wait [#allocation3], 128  }
   0x5   :  { %94 = vsyncadd [#allocation3], 4294967168  ;;  %s98_s11 = smov [#allocation5]   ;;  %s33_s15 = sshll.u32 %s116_s1, 4  ;;  %v23_v0 = vld [vmem:[#allocation2] sm:$0xff]  ;;  %s34_s15 = int_to_ptr.hbm [resolvable:$true] %s33_s15 }
   0x6   :  { %s31_s12 = sshll.u32 %s98_s11, 4  ;;  %v24_v1 = vadd.s32 %v23_v0, %v23_v0  ;;  %s32_s12 = int_to_ptr.vmem [resolvable:$true] %s31_s12 }
   0x8   :  { %25 = vst [vmem:[#allocation5] sm:$0xff] %v24_v1 }
   0x9   :  { %36 = dma.vmem_to_hbm [thread:$0]  %s32_s12, 128, %s34_s15, [#allocation4]  }
   0xa   :  { %95 = dma.done.wait [#allocation4], 128  }
   0xb   :  { %96 = vsyncadd [#allocation4], 4294967168 }
   0xc   :  { %41 = vsyncpa [#allocation3], 1 }
   0xd   :  { %42 = vsyncpa [#allocation4], 1 }

</bundles_post_ra>
